<compile_context>
chip_gen: v6e
topology: v6e:2x2x1
jax: 0.10.0
libtpu: 0.0.40
codegen_flags: <defaults>
</compile_context>

<pallas_src>
import functools

import jax
import jax.numpy as jnp
from jax.experimental import pallas as pl
from jax.experimental.pallas import tpu as pltpu

IN_DIM = 259   # Critic input features (PyTorch spec)
IN_PAD = 384   # zero-padded feature dim used inside the kernel (multiple of 128)
HID = 512


def _round_up(n, m):
    return (n + m - 1) // m * m


def critic_kernel(x_ref, w1_ref, b1_ref, w2_ref, b2_ref, w3_ref, b3_ref,
                  o_ref, xpad_ref):
    tb = x_ref.shape[0]
    # In-kernel bf16 cast + feature zero-pad 259 -> 384 (VPU/store work, hides
    # under MXU time).  Zero the last, lane-aligned 128-wide tile first, then
    # overwrite lanes [0, 259) with the cast input -- order matters (256 < 259).
    xpad_ref[:, IN_PAD - 128:] = jnp.zeros((tb, 128), jnp.bfloat16)
    xpad_ref[:, :IN_DIM] = x_ref[...].astype(jnp.bfloat16)

    # fc1 + relu : bf16 MXU matmul, f32 accumulation
    h1 = jnp.dot(xpad_ref[...], w1_ref[...], preferred_element_type=jnp.float32)
    h1 = jnp.maximum(h1 + b1_ref[...], 0.0)
    # fc2 + relu
    h2 = jnp.dot(h1.astype(jnp.bfloat16), w2_ref[...],
                 preferred_element_type=jnp.float32)
    h2 = jnp.maximum(h2 + b2_ref[...], 0.0)
    # fc3 (out_features = 1): VPU multiply + lane reduce instead of an N=1 matmul
    w3 = w3_ref[...].astype(jnp.float32)                        # (1, HID)
    o = jnp.sum(h2 * w3, axis=-1, keepdims=True) + b3_ref[...]  # (TB, 1)
    o_ref[...] = o.astype(o_ref.dtype)


def _pick_batch_tile(batch, block_b):
    """Batch tile: shrink for small B; for large B keep padding waste small."""
    if batch <= block_b:
        return _round_up(batch, 8)
    n_tiles = -(-batch // block_b)
    per_tile = -(-batch // n_tiles)
    return min(block_b, _round_up(per_tile, 256))


@functools.partial(jax.jit, static_argnames=("block_b",))
def critic_forward(x, params, block_b=1024):
    """x: [B, 259] float32 -> [B] float32 (== torch.squeeze(fc3(...), dim=1))."""
    w1, b1, w2, b2, w3, b3 = params
    B = x.shape[0]

    TB = _pick_batch_tile(B, block_b)
    B_pad = _round_up(B, TB)
    # Only the batch dim is padded; single fused pad, skipped when unnecessary.
    xp = x if B_pad == B else jnp.pad(x, ((0, B_pad - B), (0, 0)))

    grid = (B_pad // TB,)
    const = lambda shape: pl.BlockSpec(shape, lambda i: (0,) * len(shape))

    out = pl.pallas_call(
        critic_kernel,
        out_shape=jax.ShapeDtypeStruct((B_pad, 1), jnp.float32),
        grid=grid,
        in_specs=[
            pl.BlockSpec((TB, IN_DIM), lambda i: (i, 0)),  # x: raw f32, batch-tiled
            const((IN_PAD, HID)),                          # w1 (bf16, VMEM-resident)
            const((1, HID)),                               # b1
            const((HID, HID)),                             # w2
            const((1, HID)),                               # b2
            const((1, HID)),                               # w3 as a row vector
            const((1, 1)),                                 # b3
        ],
        out_specs=pl.BlockSpec((TB, 1), lambda i: (i, 0)),
        scratch_shapes=[pltpu.VMEM((TB, IN_PAD), jnp.bfloat16)],  # padded-x staging
        compiler_params=pltpu.CompilerParams(
            # Batch tiles are independent -> "parallel"; no-op on single-TC
            # v5e/v6e.  On v7x, confirm in xprof that both TCs are busy and
            # switch to pltpu.CORE_PARALLEL if not.
            dimension_semantics=("parallel",),
            vmem_limit_bytes=32 * 1024 * 1024,
        ),
    )(xp, w1, b1, w2, b2, w3, b3)

    # drop batch padding and squeeze the trailing dim (torch.squeeze(x, dim=1))
    return out[:B, 0]


def init_params(key):
    """Deterministic init mimicking nn.Linear's U(-1/sqrt(fan_in), 1/sqrt(fan_in)).

    Weights stored [in_features, out_features] in bf16 (x @ W == PyTorch x @ W.T),
    biases in f32.  w1 is zero-padded along fan_in to IN_PAD (one-time, at init);
    w3 is kept as a (1, HID) row vector for the in-kernel VPU reduce.
    """
    def linear(k, fan_in, fan_out, pad_in=None):
        kw, kb = jax.random.split(k)
        bound = 1.0 / jnp.sqrt(jnp.float32(fan_in))
        w = jax.random.uniform(kw, (fan_in, fan_out), jnp.float32, -bound, bound)
        if pad_in is not None and pad_in > fan_in:
            w = jnp.concatenate(
                [w, jnp.zeros((pad_in - fan_in, fan_out), jnp.float32)], axis=0)
        b = jax.random.uniform(kb, (1, fan_out), jnp.float32, -bound, bound)
        return w.astype(jnp.bfloat16), b

    k1, k2, k3 = jax.random.split(key, 3)
    w1, b1 = linear(k1, IN_DIM, HID, pad_in=IN_PAD)
    w2, b2 = linear(k2, HID, HID)
    w3_col, b3 = linear(k3, HID, 1)        # (HID, 1), (1, 1)
    w3 = w3_col.T                          # (1, HID) row for the lane reduce
    return (w1, b1, w2, b2, w3, b3)


if __name__ == "__main__":
    key = jax.random.PRNGKey(0)
    k_params, k_x = jax.random.split(key)

    params = init_params(k_params)
    B = 8  # small batch
    x = jax.random.normal(k_x, (B, IN_DIM), jnp.float32)

    y = critic_forward(x, params)
    jax.block_until_ready(y)

    # plain-JAX reference mirroring the kernel's bf16 casts (f32 math otherwise)
    w1, b1, w2, b2, w3, b3 = params
    xb = x.astype(jnp.bfloat16).astype(jnp.float32)
    h = jnp.maximum(xb @ w1[:IN_DIM].astype(jnp.float32) + b1, 0.0)
    h = h.astype(jnp.bfloat16).astype(jnp.float32)
    h = jnp.maximum(h @ w2.astype(jnp.float32) + b2, 0.0)
    ref = jnp.sum(h * w3.astype(jnp.float32), axis=-1) + b3[0, 0]

    assert y.shape == (B,)
    assert jnp.allclose(y, ref, atol=2e-3, rtol=2e-3), float(
        jnp.max(jnp.abs(y - ref)))

    print("KERNEL_OK")
</pallas_src>

<mosaic_0001>
module attributes {stable_mosaic.version = 11 : i64} {
  func.func @critic_kernel(%arg0: i32, %arg1: memref<8x259xf32, #tpu.memory_space<vmem>>, %arg2: memref<384x512xbf16, #tpu.memory_space<vmem>>, %arg3: memref<1x512xf32, #tpu.memory_space<vmem>>, %arg4: memref<512x512xbf16, #tpu.memory_space<vmem>>, %arg5: memref<1x512xf32, #tpu.memory_space<vmem>>, %arg6: memref<1x512xbf16, #tpu.memory_space<vmem>>, %arg7: memref<1x1xf32, #tpu.memory_space<vmem>>, %arg8: memref<8x1xf32, #tpu.memory_space<vmem>>, %arg9: memref<8x384xbf16, #tpu.memory_space<vmem>>) attributes {dimension_semantics = [#tpu.dimension_semantics<parallel>], iteration_bounds = array<i64: 1>, scalar_prefetch = 0 : i64, scratch_operands = 1 : i64, tpu.core_type = #tpu.core_type<tc>, window_params = [{transform_indices = @transform_0, window_bounds = array<i64: 8, 259>}, {pipeline_mode = #tpu.pipeline_mode<synchronous>, transform_indices = @transform_1, window_bounds = array<i64: 384, 512>}, {pipeline_mode = #tpu.pipeline_mode<synchronous>, transform_indices = @transform_2, window_bounds = array<i64: 1, 512>}, {pipeline_mode = #tpu.pipeline_mode<synchronous>, transform_indices = @transform_3, window_bounds = array<i64: 512, 512>}, {pipeline_mode = #tpu.pipeline_mode<synchronous>, transform_indices = @transform_4, window_bounds = array<i64: 1, 512>}, {pipeline_mode = #tpu.pipeline_mode<synchronous>, transform_indices = @transform_5, window_bounds = array<i64: 1, 512>}, {pipeline_mode = #tpu.pipeline_mode<synchronous>, transform_indices = @transform_6, window_bounds = array<i64: 1, 1>}, {transform_indices = @transform_7, window_bounds = array<i64: 8, 1>}]} {
    %cst = arith.constant 0.000000e+00 : bf16
    %0 = vector.broadcast %cst : bf16 to vector<8x128xbf16>
    %c0 = arith.constant 0 : index
    %c256 = arith.constant 256 : index
    %1 = vector.load %arg9[%c0, %c256] : memref<8x384xbf16, #tpu.memory_space<vmem>>, vector<8x128xbf16>
    tpu.vector_store %arg9[%c0, %c256], %0 {strides = array<i32>} : memref<8x384xbf16, #tpu.memory_space<vmem>>, vector<8x128xbf16>,
    %c0_0 = arith.constant 0 : index
    %c0_1 = arith.constant 0 : index
    %2 = vector.load %arg1[%c0_0, %c0_1] : memref<8x259xf32, #tpu.memory_space<vmem>>, vector<8x259xf32>
    %3 = arith.truncf %2 : vector<8x259xf32> to vector<8x259xbf16>
    %c0_2 = arith.constant 0 : index
    %c0_3 = arith.constant 0 : index
    %4 = vector.load %arg9[%c0_2, %c0_3] : memref<8x384xbf16, #tpu.memory_space<vmem>>, vector<8x259xbf16>
    tpu.vector_store %arg9[%c0_2, %c0_3], %3 {strides = array<i32>} : memref<8x384xbf16, #tpu.memory_space<vmem>>, vector<8x259xbf16>,
    %c0_4 = arith.constant 0 : index
    %c0_5 = arith.constant 0 : index
    %5 = vector.load %arg9[%c0_4, %c0_5] : memref<8x384xbf16, #tpu.memory_space<vmem>>, vector<8x384xbf16>
    %c0_6 = arith.constant 0 : index
    %c0_7 = arith.constant 0 : index
    %6 = vector.load %arg2[%c0_6, %c0_7] : memref<384x512xbf16, #tpu.memory_space<vmem>>, vector<384x512xbf16>
    %cst_8 = arith.constant dense<0.000000e+00> : vector<8x512xf32>
    %7 = tpu.matmul %5, %6, %cst_8 {dimension_numbers = #tpu.dot_dimension_numbers<[1], [0], [0], [1], [0, 0, 1, 1], [], []>} : vector<8x384xbf16>, vector<384x512xbf16>, vector<8x512xf32> -> vector<8x512xf32>
    %c0_9 = arith.constant 0 : index
    %c0_10 = arith.constant 0 : index
    %8 = vector.load %arg3[%c0_9, %c0_10] : memref<1x512xf32, #tpu.memory_space<vmem>>, vector<1x512xf32>
    %9 = vector.broadcast %8 : vector<1x512xf32> to vector<8x512xf32>
    %10 = arith.addf %7, %9 : vector<8x512xf32>
    %cst_11 = arith.constant 0.000000e+00 : f32
    %11 = vector.broadcast %cst_11 : f32 to vector<8x512xf32>
    %12 = arith.maximumf %10, %11 : vector<8x512xf32>
    %13 = arith.truncf %12 : vector<8x512xf32> to vector<8x512xbf16>
    %c0_12 = arith.constant 0 : index
    %c0_13 = arith.constant 0 : index
    %14 = vector.load %arg4[%c0_12, %c0_13] : memref<512x512xbf16, #tpu.memory_space<vmem>>, vector<512x512xbf16>
    %cst_14 = arith.constant dense<0.000000e+00> : vector<8x512xf32>
    %15 = tpu.matmul %13, %14, %cst_14 {dimension_numbers = #tpu.dot_dimension_numbers<[1], [0], [0], [1], [0, 0, 1, 1], [], []>} : vector<8x512xbf16>, vector<512x512xbf16>, vector<8x512xf32> -> vector<8x512xf32>
    %c0_15 = arith.constant 0 : index
    %c0_16 = arith.constant 0 : index
    %16 = vector.load %arg5[%c0_15, %c0_16] : memref<1x512xf32, #tpu.memory_space<vmem>>, vector<1x512xf32>
    %17 = vector.broadcast %16 : vector<1x512xf32> to vector<8x512xf32>
    %18 = arith.addf %15, %17 : vector<8x512xf32>
    %cst_17 = arith.constant 0.000000e+00 : f32
    %19 = vector.broadcast %cst_17 : f32 to vector<8x512xf32>
    %20 = arith.maximumf %18, %19 : vector<8x512xf32>
    %c0_18 = arith.constant 0 : index
    %c0_19 = arith.constant 0 : index
    %21 = vector.load %arg6[%c0_18, %c0_19] : memref<1x512xbf16, #tpu.memory_space<vmem>>, vector<1x512xbf16>
    %22 = arith.extf %21 : vector<1x512xbf16> to vector<1x512xf32>
    %23 = vector.broadcast %22 : vector<1x512xf32> to vector<8x512xf32>
    %24 = arith.mulf %20, %23 : vector<8x512xf32>
    %cst_20 = arith.constant dense<0.000000e+00> : vector<8xf32>
    %25 = vector.multi_reduction <add>, %24, %cst_20 [1] : vector<8x512xf32> to vector<8xf32>
    %26 = vector.shape_cast %25 : vector<8xf32> to vector<8x1xf32>
    %c0_21 = arith.constant 0 : index
    %c0_22 = arith.constant 0 : index
    %27 = vector.load %arg7[%c0_21, %c0_22] : memref<1x1xf32, #tpu.memory_space<vmem>>, vector<1x1xf32>
    %28 = vector.broadcast %27 : vector<1x1xf32> to vector<8x1xf32>
    %29 = arith.addf %26, %28 : vector<8x1xf32>
    %c0_23 = arith.constant 0 : index
    %c0_24 = arith.constant 0 : index
    %30 = vector.load %arg8[%c0_23, %c0_24] : memref<8x1xf32, #tpu.memory_space<vmem>>, vector<8x1xf32>
    tpu.vector_store %arg8[%c0_23, %c0_24], %29 {strides = array<i32>} : memref<8x1xf32, #tpu.memory_space<vmem>>, vector<8x1xf32>,
    return
  }
  func.func @transform_0(%arg0: i32) -> (i32, i32) {
    %c0_i32 = arith.constant 0 : i32
    %c0_i32_0 = arith.constant 0 : i32
    return %arg0, %c0_i32 : i32, i32
  }
  func.func @transform_1(%arg0: i32) -> (i32, i32) {
    %c0_i32 = arith.constant 0 : i32
    %c0_i32_0 = arith.constant 0 : i32
    %c0_i32_1 = arith.constant 0 : i32
    return %c0_i32, %c0_i32_0 : i32, i32
  }
  func.func @transform_2(%arg0: i32) -> (i32, i32) {
    %c0_i32 = arith.constant 0 : i32
    %c0_i32_0 = arith.constant 0 : i32
    %c0_i32_1 = arith.constant 0 : i32
    return %c0_i32, %c0_i32_0 : i32, i32
  }
  func.func @transform_3(%arg0: i32) -> (i32, i32) {
    %c0_i32 = arith.constant 0 : i32
    %c0_i32_0 = arith.constant 0 : i32
    %c0_i32_1 = arith.constant 0 : i32
    return %c0_i32, %c0_i32_0 : i32, i32
  }
  func.func @transform_4(%arg0: i32) -> (i32, i32) {
    %c0_i32 = arith.constant 0 : i32
    %c0_i32_0 = arith.constant 0 : i32
    %c0_i32_1 = arith.constant 0 : i32
    return %c0_i32, %c0_i32_0 : i32, i32
  }
  func.func @transform_5(%arg0: i32) -> (i32, i32) {
    %c0_i32 = arith.constant 0 : i32
    %c0_i32_0 = arith.constant 0 : i32
    %c0_i32_1 = arith.constant 0 : i32
    return %c0_i32, %c0_i32_0 : i32, i32
  }
  func.func @transform_6(%arg0: i32) -> (i32, i32) {
    %c0_i32 = arith.constant 0 : i32
    %c0_i32_0 = arith.constant 0 : i32
    %c0_i32_1 = arith.constant 0 : i32
    return %c0_i32, %c0_i32_0 : i32, i32
  }
  func.func @transform_7(%arg0: i32) -> (i32, i32) {
    %c0_i32 = arith.constant 0 : i32
    %c0_i32_0 = arith.constant 0 : i32
    return %arg0, %c0_i32 : i32, i32
  }
}

</mosaic_0001>

<bundles_post_ra>
// kernel: critic_forward.1
= control target key start
LH: loop header
LB: loop body
LE: loop exit
PB: predicated region body
PF: predicated region fallthrough
CT: control target
= control target key end

     0   :  { %s2690_s0 = inlined_call_operand.hbm [shape: f32[8,259], index: 0, kind: input, shape index: {}]   ;;  %s2691_s1 = inlined_call_operand.hbm [shape: bf16[384,512], index: 1, kind: input, shape index: {}]   ;;  %s2692_s2 = inlined_call_operand.vmem [shape: f32[1,512], index: 2, kind: input, shape index: {}]   ;;  %s2693_s3 = inlined_call_operand.hbm [shape: bf16[512,512], index: 3, kind: input, shape index: {}]   ;;  %s2694_s4 = inlined_call_operand.vmem [shape: f32[1,512], index: 4, kind: input, shape index: {}]   ;;  %s2695_s5 = inlined_call_operand.hbm [shape: bf16[1,512], index: 5, kind: input, shape index: {}]   ;;  %s2696_s6 = inlined_call_operand.<no memory space> [shape: f32[1,1], index: 6, kind: input, shape index: {}]   ;;  %s2697_s7 = inlined_call_operand.vmem [shape: f32[8,1], index: 7, kind: output, shape index: {}]  }
   0x1   :  { %v12_v0 = vstv %s2696_s6 }
   0x2   :  { %13 = vst [vmem:[#allocation3] sm:$0x1] %v12_v0 }
   0x3   :  { %14 = vsyncpa [#allocation5], 0 }
   0x4   :  { %15 = vsyncpa [#allocation7], 0 }
   0x5   :  { %16 = vsyncpa [#allocation10], 0  ;;  %s2570_s26 = smov [#allocation6]  }
   0x6   :  { %s32_s27 = sshll.u32 %s2570_s26, 4  ;;  %s33_s27 = int_to_ptr.vmem [resolvable:$true] %s32_s27 }
   0x7   :  { %s2492_s28 = scalar_lea.vmem %s33_s27, 12288  ;;  %p2497_p1 = scmp.lt.s32.totalorder %s33_s27, %s33_s27 }
   0x8   :  { %p2493_p0 = scmp.ne.s32.totalorder %s33_s27, %s2492_s28  ;;  %p2498_p2 = scmp.lt.s32.totalorder %s2492_s28, %s2492_s28 }
   0xa   :  { %p2499_p3 = por %p2498_p2, %p2497_p1 }
   0xc   :  { %p2500_p4 = pnand %p2499_p3, %p2493_p0 }
   0xe   :  { %2503 = shalt.err (!%p2500_p4)
}
   0xf   :  { %s2571_s29 = smov 256   ;;  %s2572_s30 = smov 16  }
  0x10   :  { %38 = dma.hbm_to_vmem [thread:$0]  %s2691_s1, 12288, %s33_s27, [#allocation7], %s2571_s29, %s2571_s29, %s2572_s30  }
  0x11   :  { %s2573_s6 = smov [#allocation4]   ;;  %s2574_s11 = smov [#allocation8]  }
  0x12   :  { %s23_s10 = sshll.u32 %s2573_s6, 4  ;;  %s46_s12 = sshll.u32 %s2574_s11, 4  ;;  %s24_s10 = int_to_ptr.vmem [resolvable:$true] %s23_s10  ;;  %s47_s12 = int_to_ptr.vmem [resolvable:$true] %s46_s12 }
  0x13   :  { %s2512_s13 = scalar_lea.vmem %s24_s10, 384  ;;  %p2517_p6 = scmp.lt.s32.totalorder %s24_s10, %s24_s10 }
  0x14   :  { %p2513_p5 = scmp.ne.s32.totalorder %s24_s10, %s2512_s13  ;;  %p2518_p7 = scmp.lt.s32.totalorder %s2512_s13, %s2512_s13 }
  0x16   :  { %p2519_p8 = por %p2518_p7, %p2517_p6 }
  0x18   :  { %p2520_p9 = pnand %p2519_p8, %p2513_p5 }
  0x1a   :  { %2523 = shalt.err (!%p2520_p9)
}
  0x1b   :  { %26 = dma.hbm_to_vmem [thread:$0]  %s2690_s0, 384, %s24_s10, [#allocation5]  }
  0x1c   :  { %s2532_s16 = scalar_lea.vmem %s47_s12, 16384  ;;  %p2537_p11 = scmp.lt.s32.totalorder %s47_s12, %s47_s12 }
  0x1d   :  { %p2533_p10 = scmp.ne.s32.totalorder %s47_s12, %s2532_s16  ;;  %p2538_p12 = scmp.lt.s32.totalorder %s2532_s16, %s2532_s16 }
  0x1f   :  { %p2539_p13 = por %p2538_p12, %p2537_p11 }
  0x21   :  { %p2540_p0 = pnand %p2539_p13, %p2533_p10 }
  0x23   :  { %2543 = shalt.err (!%p2540_p0)
}
  0x24   :  { %52 = dma.hbm_to_vmem [thread:$0]  %s2693_s3, 16384, %s47_s12, [#allocation7], %s2571_s29, %s2571_s29, %s2572_s30  }
  0x25   :  { %s2575_s18 = smov [#allocation9]  }
  0x26   :  { %s61_s19 = sshll.u32 %s2575_s18, 4  ;;  %s62_s19 = int_to_ptr.vmem [resolvable:$true] %s61_s19 }
  0x27   :  { %s2552_s20 = scalar_lea.vmem %s62_s19, 64  ;;  %p2557_p2 = scmp.lt.s32.totalorder %s62_s19, %s62_s19 }
  0x28   :  { %p2553_p1 = scmp.ne.s32.totalorder %s62_s19, %s2552_s20  ;;  %p2558_p3 = scmp.lt.s32.totalorder %s2552_s20, %s2552_s20 }
  0x2a   :  { %p2559_p4 = por %p2558_p3, %p2557_p2 }
  0x2c   :  { %p2560_p5 = pnand %p2559_p4, %p2553_p1 }
  0x2e   :  { %2563 = shalt.err (!%p2560_p5)
}
  0x2f   :  { %64 = dma.hbm_to_vmem [thread:$0]  %s2695_s5, 64, %s62_s19, [#allocation10]  }
  0x30   :  { %2564 = dma.done.wait [#allocation5], 384  }
  0x31   :  { %2565 = vsyncadd [#allocation5], 4294966912 }
  0x32   :  { %2566 = dma.done.wait [#allocation7], 28672  }
  0x33   :  { %2567 = vsyncadd [#allocation7], 4294938624 }
  0x34   :  { %2568 = dma.done.wait [#allocation10], 64  }
  0x35   :  { %2569 = vsyncadd [#allocation10], 4294967232  ;;  %v2576_v1 = vmov 0   ;;  %v2145_v2 = vld [vmem:[#allocation6 + $0xe4] ss:$16 sps:$4 sm:$0xff]   ;;  %v83_v28 = vld [vmem:[#allocation4 + $0x10] sm:$0xff] }
  0x36   :  { %80 = vst [vmem:[#allocation2 + $0x8] sm:$0xf] %v2576_v1  ;;  %784 = vmatprep.mubr.bf16.mxu1 %v2576_v1  ;;  %v2147_v3 = vld [vmem:[#allocation6 + $0x2e4] ss:$16 sps:$4 sm:$0xff]   ;;  %711 = vmatprep.subr.bf16.mxu0 %v2145_v2  ;;  %v2149_v4 = vld [vmem:[#allocation6 + $0xe0] ss:$16 sps:$4 sm:$0xff]   ;;  %v2137_v29 = vpack.c.bf16 %v83_v28, %v83_v28 }
  0x37   :  { %v2150_v5 = vld [vmem:[#allocation6 + $0x2e0] ss:$16 sps:$4 sm:$0xff]   ;;  %752 = vmatprep.subr.bf16.mxu1 %v2147_v3  ;;  %v2151_v6 = vld [vmem:[#allocation6 + $0xc4] ss:$16 sps:$4 sm:$0xff]   ;;  %712 = vmatpush1.bf16.msra.mxu0 %v2149_v4  ;;  %vm98_vm0 = vcmask 19456   ;;  %v81_v53 = vld [vmem:[#allocation4] sm:$0xff] }
  0x38   :  { %753 = vmatpush1.bf16.msra.mxu1 %v2150_v5  ;;  %v2153_v7 = vld [vmem:[#allocation6 + $0x2c4] ss:$16 sps:$4 sm:$0xff]   ;;  %v2155_v8 = vld [vmem:[#allocation6 + $0xc0] ss:$16 sps:$4 sm:$0xff]   ;;  %713 = vmatprep.subr.bf16.mxu0 %v2151_v6  ;;  %99 = vst.msk [vmem:[#allocation2 + $0x8] sm:$0xf] %vm98_vm0, %v2137_v29 }
  0x39   :  { %v2156_v9 = vld [vmem:[#allocation6 + $0x2c0] ss:$16 sps:$4 sm:$0xff]   ;;  %754 = vmatprep.subr.bf16.mxu1 %v2153_v7  ;;  %v2157_v10 = vld [vmem:[#allocation6 + $0xa4] ss:$16 sps:$4 sm:$0xff]   ;;  %v2198_v37 = vld [vmem:[#allocation6 + $0xec] ss:$16 sps:$4 sm:$0xff]  }
  0x3a   :  { %v2159_v11 = vld [vmem:[#allocation6 + $0x2a4] ss:$16 sps:$4 sm:$0xff]   ;;  %v2161_v12 = vld [vmem:[#allocation6 + $0xa0] ss:$16 sps:$4 sm:$0xff]   ;;  %v2196_v39 = vld [vmem:[#allocation6 + $0xe8] ss:$16 sps:$4 sm:$0xff]  }
  0x3b   :  { %v2162_v13 = vld [vmem:[#allocation6 + $0x2a0] ss:$16 sps:$4 sm:$0xff]   ;;  %714 = vmatpush1.bf16.msra.mxu0 %v2155_v8  ;;  %v2163_v14 = vld [vmem:[#allocation6 + $0x84] ss:$16 sps:$4 sm:$0xff]   ;;  %v2204_v42 = vld [vmem:[#allocation6 + $0xcc] ss:$16 sps:$4 sm:$0xff]  }
  0x3c   :  { %755 = vmatpush1.bf16.msra.mxu1 %v2156_v9  ;;  %715 = vmatprep.subr.bf16.mxu0 %v2157_v10  ;;  %v2165_v15 = vld [vmem:[#allocation6 + $0x284] ss:$16 sps:$4 sm:$0xff]   ;;  %v2167_v16 = vld [vmem:[#allocation6 + $0x80] ss:$16 sps:$4 sm:$0xff]   ;;  %v2202_v43 = vld [vmem:[#allocation6 + $0xc8] ss:$16 sps:$4 sm:$0xff]  }
  0x3d   :  { %756 = vmatprep.subr.bf16.mxu1 %v2159_v11  ;;  %v2168_v17 = vld [vmem:[#allocation6 + $0x280] ss:$16 sps:$4 sm:$0xff]   ;;  %v2169_v18 = vld [vmem:[#allocation6 + $0x64] ss:$16 sps:$4 sm:$0xff]   ;;  %v2210_v46 = vld [vmem:[#allocation6 + $0xac] ss:$16 sps:$4 sm:$0xff]   ;;  %v2637_v11 = vpack.c.bf16 %v81_v53, %v81_v53 }
  0x3e   :  { %v2171_v19 = vld [vmem:[#allocation6 + $0x264] ss:$16 sps:$4 sm:$0xff]   ;;  %v2173_v20 = vld [vmem:[#allocation6 + $0x60] ss:$16 sps:$4 sm:$0xff]   ;;  %v2208_v47 = vld [vmem:[#allocation6 + $0xa8] ss:$16 sps:$4 sm:$0xff]  }
  0x3f   :  { %716 = vmatpush1.bf16.msra.mxu0 %v2161_v12  ;;  %v2174_v21 = vld [vmem:[#allocation6 + $0x260] ss:$16 sps:$4 sm:$0xff]   ;;  %v2175_v22 = vld [vmem:[#allocation6 + $0x44] ss:$16 sps:$4 sm:$0xff]   ;;  %v2216_v50 = vld [vmem:[#allocation6 + $0x8c] ss:$16 sps:$4 sm:$0xff]  }
  0x40   :  { %757 = vmatpush1.bf16.msra.mxu1 %v2162_v13  ;;  %717 = vmatprep.subr.bf16.mxu0 %v2163_v14  ;;  %v2177_v23 = vld [vmem:[#allocation6 + $0x244] ss:$16 sps:$4 sm:$0xff]   ;;  %v2179_v24 = vld [vmem:[#allocation6 + $0x40] ss:$16 sps:$4 sm:$0xff]   ;;  %v2214_v51 = vld [vmem:[#allocation6 + $0x88] ss:$16 sps:$4 sm:$0xff]  }
  0x41   :  { %758 = vmatprep.subr.bf16.mxu1 %v2165_v15  ;;  %v2180_v25 = vld [vmem:[#allocation6 + $0x240] ss:$16 sps:$4 sm:$0xff]   ;;  %v2181_v26 = vld [vmem:[#allocation6 + $0x24] ss:$16 sps:$4 sm:$0xff]   ;;  %v2222_v56 = vld [vmem:[#allocation6 + $0x6c] ss:$16 sps:$4 sm:$0xff]  }
  0x42   :  { %v2183_v27 = vld [vmem:[#allocation6 + $0x224] ss:$16 sps:$4 sm:$0xff]   ;;  %v2185_v30 = vld [vmem:[#allocation6 + $0x20] ss:$16 sps:$4 sm:$0xff]   ;;  %v2220_v57 = vld [vmem:[#allocation6 + $0x68] ss:$16 sps:$4 sm:$0xff]  }
  0x43   :  { %718 = vmatpush1.bf16.msra.mxu0 %v2167_v16  ;;  %v2186_v31 = vld [vmem:[#allocation6 + $0x220] ss:$16 sps:$4 sm:$0xff]   ;;  %v2187_v32 = vld [vmem:[#allocation6 + $0x4] ss:$16 sps:$4 sm:$0xff]   ;;  %v2228_v61 = vld [vmem:[#allocation6 + $0x4c] ss:$16 sps:$4 sm:$0xff]  }
  0x44   :  { %759 = vmatpush1.bf16.msra.mxu1 %v2168_v17  ;;  %719 = vmatprep.subr.bf16.mxu0 %v2169_v18  ;;  %v2189_v33 = vld [vmem:[#allocation6 + $0x204] ss:$16 sps:$4 sm:$0xff]   ;;  %v2191_v34 = vld [vmem:[#allocation6] ss:$16 sps:$4 sm:$0xff]   ;;  %v2226_v62 = vld [vmem:[#allocation6 + $0x48] ss:$16 sps:$4 sm:$0xff]  }
  0x45   :  { %760 = vmatprep.subr.bf16.mxu1 %v2171_v19  ;;  %v2192_v35 = vld [vmem:[#allocation6 + $0x200] ss:$16 sps:$4 sm:$0xff]   ;;  %v2193_v36 = vld [vmem:[#allocation6 + $0x1e4] ss:$16 sps:$4 sm:$0xff]   ;;  %v2234_v2 = vld [vmem:[#allocation6 + $0x2c] ss:$16 sps:$4 sm:$0xff]  }
  0x46   :  { %v2634_v38 = vld [vmem:[#allocation2 + $0x8] ss:$0 sps:$4 sm:$0xff]   ;;  %v2200_v41 = vld [vmem:[#allocation6 + $0x1c4] ss:$16 sps:$4 sm:$0xff]   ;;  %v2232_v3 = vld [vmem:[#allocation6 + $0x28] ss:$16 sps:$4 sm:$0xff]  }
  0x47   :  { %720 = vmatpush1.bf16.msra.mxu0 %v2173_v20  ;;  %v2199_v40 = vld [vmem:[#allocation6 + $0x1e0] ss:$16 sps:$4 sm:$0xff]   ;;  %v2206_v45 = vld [vmem:[#allocation6 + $0x1a4] ss:$16 sps:$4 sm:$0xff]   ;;  %v2240_v6 = vld [vmem:[#allocation6 + $0xc] ss:$16 sps:$4 sm:$0xff]  }
  0x48   :  { %761 = vmatpush1.bf16.msra.mxu1 %v2174_v21  ;;  %721 = vmatprep.subr.bf16.mxu0 %v2175_v22  ;;  %v2205_v44 = vld [vmem:[#allocation6 + $0x1c0] ss:$16 sps:$4 sm:$0xff]   ;;  %v2212_v49 = vld [vmem:[#allocation6 + $0x184] ss:$16 sps:$4 sm:$0xff]   ;;  %v2238_v7 = vld [vmem:[#allocation6 + $0x8] ss:$16 sps:$4 sm:$0xff]  }
  0x49   :  { %762 = vmatprep.subr.bf16.mxu1 %v2177_v23  ;;  %v2211_v48 = vld [vmem:[#allocation6 + $0x1a0] ss:$16 sps:$4 sm:$0xff]   ;;  %v2218_v55 = vld [vmem:[#allocation6 + $0x164] ss:$16 sps:$4 sm:$0xff]   ;;  %v2244_v9 = vld [vmem:[#allocation6 + $0x1ec] ss:$16 sps:$4 sm:$0xff]  }
  0x4a   :  { %v2217_v52 = vld [vmem:[#allocation6 + $0x180] ss:$16 sps:$4 sm:$0xff]   ;;  %v2224_v60 = vld [vmem:[#allocation6 + $0x144] ss:$16 sps:$4 sm:$0xff]   ;;  %v2247_v10 = vld [vmem:[#allocation6 + $0x2ec] ss:$16 sps:$4 sm:$0xff]  }
  0x4b   :  { %722 = vmatpush1.bf16.msra.mxu0 %v2179_v24  ;;  %v82_v54 = vld [vmem:[#allocation4 + $0x8] sm:$0xff]  ;;  %v2242_v12 = vld [vmem:[#allocation6 + $0x1e8] ss:$16 sps:$4 sm:$0xff]   ;;  %v2250_v14 = vld [vmem:[#allocation6 + $0x1cc] ss:$16 sps:$4 sm:$0xff]   ;;  %vm1897_vm1 = vcmask 7168  }
  0x4c   :  { %763 = vmatpush1.bf16.msra.mxu1 %v2180_v25  ;;  %723 = vmatprep.subr.bf16.mxu0 %v2181_v26  ;;  %v2482_v58 = vpack.c.bf16 %v82_v54, %v82_v54  ;;  %v2223_v59 = vld [vmem:[#allocation6 + $0x160] ss:$16 sps:$4 sm:$0xff]   ;;  %v2230_v0 = vld [vmem:[#allocation6 + $0x124] ss:$16 sps:$4 sm:$0xff]   ;;  %v2245_v13 = vld [vmem:[#allocation6 + $0x2e8] ss:$16 sps:$4 sm:$0xff]  }
  0x4d   :  { %764 = vmatprep.subr.bf16.mxu1 %v2183_v27  ;;  %v2229_v63 = vld [vmem:[#allocation6 + $0x140] ss:$16 sps:$4 sm:$0xff]   ;;  %v2236_v5 = vld [vmem:[#allocation6 + $0x104] ss:$16 sps:$4 sm:$0xff]   ;;  %v2253_v15 = vld [vmem:[#allocation6 + $0x2cc] ss:$16 sps:$4 sm:$0xff]  }
  0x4e   :  { %743 = vmatprep.mubr.bf16.mxu0 %v2482_v58  ;;  %v2235_v4 = vld [vmem:[#allocation6 + $0x120] ss:$16 sps:$4 sm:$0xff]   ;;  %v2248_v16 = vld [vmem:[#allocation6 + $0x1c8] ss:$16 sps:$4 sm:$0xff]   ;;  %v2256_v18 = vld [vmem:[#allocation6 + $0x1ac] ss:$16 sps:$4 sm:$0xff]  }
  0x4f   :  { %724 = vmatpush1.bf16.msra.mxu0 %v2185_v30  ;;  %v2241_v8 = vld [vmem:[#allocation6 + $0x100] ss:$16 sps:$4 sm:$0xff]   ;;  %v2251_v17 = vld [vmem:[#allocation6 + $0x2c8] ss:$16 sps:$4 sm:$0xff]   ;;  %v2259_v19 = vld [vmem:[#allocation6 + $0x2ac] ss:$16 sps:$4 sm:$0xff]  }
  0x50   :  { %765 = vmatpush1.bf16.msra.mxu1 %v2186_v31  ;;  %725 = vmatprep.subr.bf16.mxu0 %v2187_v32  ;;  %v2254_v20 = vld [vmem:[#allocation6 + $0x1a8] ss:$16 sps:$4 sm:$0xff]   ;;  %v2262_v22 = vld [vmem:[#allocation6 + $0x18c] ss:$16 sps:$4 sm:$0xff]   ;;  %v2304_v53 = vld [vmem:[#allocation8 + $0x64] ss:$16 sps:$4 sm:$0xff]  }
  0x51   :  { %766 = vmatprep.subr.bf16.mxu1 %v2189_v33  ;;  %v2257_v21 = vld [vmem:[#allocation6 + $0x2a8] ss:$16 sps:$4 sm:$0xff]   ;;  %v2265_v23 = vld [vmem:[#allocation6 + $0x28c] ss:$16 sps:$4 sm:$0xff]   ;;  %v2323_v54 = vld [vmem:[#allocation8 + $0x2c0] ss:$16 sps:$4 sm:$0xff]  }
  0x52   :  { %v2260_v24 = vld [vmem:[#allocation6 + $0x188] ss:$16 sps:$4 sm:$0xff]   ;;  %v2268_v26 = vld [vmem:[#allocation6 + $0x16c] ss:$16 sps:$4 sm:$0xff]  }
  0x53   :  { %726 = vmatpush1.bf16.msra.mxu0 %v2191_v34  ;;  %v2263_v25 = vld [vmem:[#allocation6 + $0x288] ss:$16 sps:$4 sm:$0xff]   ;;  %v2271_v27 = vld [vmem:[#allocation6 + $0x26c] ss:$16 sps:$4 sm:$0xff]  }
  0x54   :  { %767 = vmatpush1.bf16.msra.mxu1 %v2192_v35  ;;  %727 = vmatprep.subr.bf16.mxu0 %v2193_v36  ;;  %v2266_v28 = vld [vmem:[#allocation6 + $0x168] ss:$16 sps:$4 sm:$0xff]   ;;  %v2274_v30 = vld [vmem:[#allocation6 + $0x14c] ss:$16 sps:$4 sm:$0xff]  }
  0x55   :  { %793 = vmatprep.subr.bf16.mxu1 %v2198_v37  ;;  %v2269_v29 = vld [vmem:[#allocation6 + $0x268] ss:$16 sps:$4 sm:$0xff]   ;;  %v2280_v33 = vld [vmem:[#allocation6 + $0x12c] ss:$16 sps:$4 sm:$0xff]  }
  0x56   :  { %v2272_v31 = vld [vmem:[#allocation6 + $0x148] ss:$16 sps:$4 sm:$0xff]   ;;  %v2283_v34 = vld [vmem:[#allocation6 + $0x22c] ss:$16 sps:$4 sm:$0xff]  }
  0x57   :  { %785 = vmatmul.mubr.bf16.vlgmr.msra.gmra.mxu1 %v2634_v38  ;;  %728 = vmatpush2.bf16.msra.mxu0 %v2199_v40  ;;  %v2275_v32 = vld [vmem:[#allocation6 + $0x248] ss:$16 sps:$4 sm:$0xff]   ;;  %v2286_v37 = vld [vmem:[#allocation6 + $0x10c] ss:$16 sps:$4 sm:$0xff]  }
  0x58   :  { %794 = vmatpush1.bf16.msra.mxu1 %v2196_v39  ;;  %729 = vmatprep.subr.bf16.mxu0 %v2200_v41  ;;  %v2278_v35 = vld [vmem:[#allocation6 + $0x128] ss:$16 sps:$4 sm:$0xff]   ;;  %v2289_v39 = vld [vmem:[#allocation6 + $0x20c] ss:$16 sps:$4 sm:$0xff]  }
  0x59   :  { %795 = vmatprep.subr.bf16.mxu1 %v2204_v42  ;;  %825 = vmatprep.mubr.bf16.mxu1 %v2482_v58  ;;  %v2281_v36 = vld [vmem:[#allocation6 + $0x228] ss:$16 sps:$4 sm:$0xff]   ;;  %v2292_v42 = vld [vmem:[#allocation8 + $0xe4] ss:$16 sps:$4 sm:$0xff]  }
  0x5a   :  { %v2284_v40 = vld [vmem:[#allocation6 + $0x108] ss:$16 sps:$4 sm:$0xff]   ;;  %v2337_v58 = vld [vmem:[#allocation8 + $0x284] ss:$16 sps:$4 sm:$0xff]  }
  0x5b   :  { %730 = vmatpush2.bf16.msra.mxu0 %v2205_v44  ;;  %v2287_v41 = vld [vmem:[#allocation6 + $0x208] ss:$16 sps:$4 sm:$0xff]   ;;  %v2295_v44 = vld [vmem:[#allocation8 + $0xc4] ss:$16 sps:$4 sm:$0xff]  }
  0x5c   :  { %796 = vmatpush1.bf16.msra.mxu1 %v2202_v43  ;;  %731 = vmatprep.subr.bf16.mxu0 %v2206_v45  ;;  %v2290_v43 = vld [vmem:[#allocation8 + $0xe0] ss:$16 sps:$4 sm:$0xff]  }
  0x5d   :  { %797 = vmatprep.subr.bf16.mxu1 %v2210_v46  ;;  %v2293_v45 = vld [vmem:[#allocation8 + $0xc0] ss:$16 sps:$4 sm:$0xff]   ;;  %v2298_v46 = vld [vmem:[#allocation8 + $0xa4] ss:$16 sps:$4 sm:$0xff]  }
  0x5f   :  { %732 = vmatpush2.bf16.msra.mxu0 %v2211_v48  ;;  %v2301_v48 = vld [vmem:[#allocation8 + $0x84] ss:$16 sps:$4 sm:$0xff]  }
  0x60   :  { %798 = vmatpush1.bf16.msra.mxu1 %v2208_v47  ;;  %733 = vmatprep.subr.bf16.mxu0 %v2212_v49  ;;  %v2296_v47 = vld [vmem:[#allocation8 + $0xa0] ss:$16 sps:$4 sm:$0xff]  }
  0x61   :  { %799 = vmatprep.subr.bf16.mxu1 %v2216_v50  ;;  %v2317_v49 = vld [vmem:[#allocation8 + $0x2e0] ss:$16 sps:$4 sm:$0xff]   ;;  %v2319_v50 = vld [vmem:[#allocation8 + $0x2e4] ss:$16 sps:$4 sm:$0xff]  }
  0x63   :  { %734 = vmatpush2.bf16.msra.mxu0 %v2217_v52  ;;  %v2299_v52 = vld [vmem:[#allocation8 + $0x80] ss:$16 sps:$4 sm:$0xff]  }
  0x64   :  { %800 = vmatpush1.bf16.msra.mxu1 %v2214_v51  ;;  %735 = vmatprep.subr.bf16.mxu0 %v2218_v55  ;;  %v2325_v51 = vld [vmem:[#allocation8 + $0x2c4] ss:$16 sps:$4 sm:$0xff]   ;;  %v2302_v55 = vld [vmem:[#allocation8 + $0x60] ss:$16 sps:$4 sm:$0xff]  }
  0x65   :  { %801 = vmatprep.subr.bf16.mxu1 %v2222_v56  ;;  %v2307_v56 = vld [vmem:[#allocation8 + $0x44] ss:$16 sps:$4 sm:$0xff]  }
  0x67   :  { %736 = vmatpush2.bf16.msra.mxu0 %v2223_v59  ;;  %v2305_v59 = vld [vmem:[#allocation8 + $0x40] ss:$16 sps:$4 sm:$0xff]  }
  0x68   :  { %802 = vmatpush1.bf16.msra.mxu1 %v2220_v57  ;;  %737 = vmatprep.subr.bf16.mxu0 %v2224_v60  ;;  %v2329_v57 = vld [vmem:[#allocation8 + $0x2a0] ss:$16 sps:$4 sm:$0xff]   ;;  %v2310_v60 = vld [vmem:[#allocation8 + $0x24] ss:$16 sps:$4 sm:$0xff]  }
  0x69   :  { %803 = vmatprep.subr.bf16.mxu1 %v2228_v61  ;;  %v2335_v61 = vld [vmem:[#allocation8 + $0x280] ss:$16 sps:$4 sm:$0xff]  }
  0x6b   :  { %738 = vmatpush2.bf16.msra.mxu0 %v2229_v63  ;;  %v2308_v63 = vld [vmem:[#allocation8 + $0x20] ss:$16 sps:$4 sm:$0xff]  }
  0x6c   :  { %804 = vmatpush1.bf16.msra.mxu1 %v2226_v62  ;;  %739 = vmatprep.subr.bf16.mxu0 %v2230_v0  ;;  %v2343_v62 = vld [vmem:[#allocation8 + $0x264] ss:$16 sps:$4 sm:$0xff]  }
  0x6d   :  { %805 = vmatprep.subr.bf16.mxu1 %v2234_v2  ;;  %v2313_v0 = vld [vmem:[#allocation8 + $0x4] ss:$16 sps:$4 sm:$0xff]   ;;  %v2341_v2 = vld [vmem:[#allocation8 + $0x260] ss:$16 sps:$4 sm:$0xff]  }
  0x6f   :  { %740 = vmatpush2.bf16.msra.mxu0 %v2235_v4  ;;  %v2311_v4 = vld [vmem:[#allocation8] ss:$16 sps:$4 sm:$0xff]  }
  0x70   :  { %806 = vmatpush1.bf16.msra.mxu1 %v2232_v3  ;;  %741 = vmatprep.subr.bf16.mxu0 %v2236_v5  ;;  %v2349_v3 = vld [vmem:[#allocation8 + $0x244] ss:$16 sps:$4 sm:$0xff]  }
  0x71   :  { %807 = vmatprep.subr.bf16.mxu1 %v2240_v6  ;;  %v2316_v5 = vld [vmem:[#allocation8 + $0x1e4] ss:$16 sps:$4 sm:$0xff]   ;;  %v2347_v6 = vld [vmem:[#allocation8 + $0x240] ss:$16 sps:$4 sm:$0xff]  }
  0x73   :  { %742 = vmatpush2.bf16.msra.mxu0 %v2241_v8  ;;  %v2322_v8 = vld [vmem:[#allocation8 + $0x1c4] ss:$16 sps:$4 sm:$0xff]  }
  0x74   :  { %808 = vmatpush1.bf16.msra.mxu1 %v2238_v7  ;;  %834 = vmatprep.subr.bf16.mxu0 %v2247_v10  ;;  %v2314_v7 = vld [vmem:[#allocation8 + $0x1e0] ss:$16 sps:$4 sm:$0xff]   ;;  %v2355_v10 = vld [vmem:[#allocation8 + $0x224] ss:$16 sps:$4 sm:$0xff]  }
  0x75   :  { %809 = vmatprep.subr.bf16.mxu1 %v2244_v9  ;;  %v2320_v9 = vld [vmem:[#allocation8 + $0x1c0] ss:$16 sps:$4 sm:$0xff]  }
  0x76   :  { %744 = vmatmul.mubr.bf16.vlgmr.msra.gmra.mxu0 %v2637_v11 }
  0x77   :  { %835 = vmatpush1.bf16.msra.mxu0 %v2245_v13  ;;  %866 = vmatprep.mubr.bf16.mxu0 %v2576_v1  ;;  %v2277_v1 = vld [vmem:[#allocation6 + $0x24c] ss:$16 sps:$4 sm:$0xff]   ;;  %v2326_v13 = vld [vmem:[#allocation8 + $0x1a0] ss:$16 sps:$4 sm:$0xff]  }
  0x78   :  { %810 = vmatpush2.bf16.msra.mxu1 %v2242_v12  ;;  %836 = vmatprep.subr.bf16.mxu0 %v2253_v15  ;;  %v2353_v12 = vld [vmem:[#allocation8 + $0x220] ss:$16 sps:$4 sm:$0xff]   ;;  %v2334_v15 = vld [vmem:[#allocation8 + $0x184] ss:$16 sps:$4 sm:$0xff]  }
  0x79   :  { %811 = vmatprep.subr.bf16.mxu1 %v2250_v14  ;;  %v2361_v14 = vld [vmem:[#allocation8 + $0x204] ss:$16 sps:$4 sm:$0xff]  }
  0x7b   :  { %837 = vmatpush1.bf16.msra.mxu0 %v2251_v17  ;;  %v2332_v17 = vld [vmem:[#allocation8 + $0x180] ss:$16 sps:$4 sm:$0xff]  }
  0x7c   :  { %812 = vmatpush2.bf16.msra.mxu1 %v2248_v16  ;;  %838 = vmatprep.subr.bf16.mxu0 %v2259_v19  ;;  %v2359_v16 = vld [vmem:[#allocation8 + $0x200] ss:$16 sps:$4 sm:$0xff]   ;;  %v2340_v19 = vld [vmem:[#allocation8 + $0x164] ss:$16 sps:$4 sm:$0xff]  }
  0x7d   :  { %813 = vmatprep.subr.bf16.mxu1 %v2256_v18  ;;  %v2364_v18 = vld [vmem:[#allocation8 + $0x3e4] ss:$16 sps:$4 sm:$0xff]  }
  0x7f   :  { %839 = vmatpush1.bf16.msra.mxu0 %v2257_v21  ;;  %v2338_v21 = vld [vmem:[#allocation8 + $0x160] ss:$16 sps:$4 sm:$0xff]  }
  0x80   :  { %814 = vmatpush2.bf16.msra.mxu1 %v2254_v20  ;;  %840 = vmatprep.subr.bf16.mxu0 %v2265_v23  ;;  %v2362_v20 = vld [vmem:[#allocation8 + $0x3e0] ss:$16 sps:$4 sm:$0xff]   ;;  %v2370_v23 = vld [vmem:[#allocation8 + $0x3c4] ss:$16 sps:$4 sm:$0xff]  }
  0x81   :  { %815 = vmatprep.subr.bf16.mxu1 %v2262_v22  ;;  %v2368_v22 = vld [vmem:[#allocation8 + $0x3c0] ss:$16 sps:$4 sm:$0xff]  }
  0x83   :  { %841 = vmatpush1.bf16.msra.mxu0 %v2263_v25  ;;  %v2344_v25 = vld [vmem:[#allocation8 + $0x140] ss:$16 sps:$4 sm:$0xff]  }
  0x84   :  { %816 = vmatpush2.bf16.msra.mxu1 %v2260_v24  ;;  %842 = vmatprep.subr.bf16.mxu0 %v2271_v27  ;;  %v2346_v24 = vld [vmem:[#allocation8 + $0x144] ss:$16 sps:$4 sm:$0xff]  }
  0x85   :  { %817 = vmatprep.subr.bf16.mxu1 %v2268_v26  ;;  %v2374_v26 = vld [vmem:[#allocation8 + $0x3a0] ss:$16 sps:$4 sm:$0xff]   ;;  %v2376_v27 = vld [vmem:[#allocation8 + $0x3a4] ss:$16 sps:$4 sm:$0xff]  }
  0x87   :  { %843 = vmatpush1.bf16.msra.mxu0 %v2269_v29  ;;  %v2350_v29 = vld [vmem:[#allocation8 + $0x120] ss:$16 sps:$4 sm:$0xff]  }
  0x88   :  { %818 = vmatpush2.bf16.msra.mxu1 %v2266_v28  ;;  %844 = vmatprep.subr.bf16.mxu0 %v2277_v1  ;;  %v2352_v28 = vld [vmem:[#allocation8 + $0x124] ss:$16 sps:$4 sm:$0xff]  }
  0x89   :  { %819 = vmatprep.subr.bf16.mxu1 %v2274_v30  ;;  %v2380_v30 = vld [vmem:[#allocation8 + $0x380] ss:$16 sps:$4 sm:$0xff]   ;;  %v2382_v1 = vld [vmem:[#allocation8 + $0x384] ss:$16 sps:$4 sm:$0xff]  }
  0x8b   :  { %845 = vmatpush1.bf16.msra.mxu0 %v2275_v32  ;;  %v2356_v32 = vld [vmem:[#allocation8 + $0x100] ss:$16 sps:$4 sm:$0xff]  }
  0x8c   :  { %820 = vmatpush2.bf16.msra.mxu1 %v2272_v31  ;;  %846 = vmatprep.subr.bf16.mxu0 %v2283_v34  ;;  %v2358_v31 = vld [vmem:[#allocation8 + $0x104] ss:$16 sps:$4 sm:$0xff]  }
  0x8d   :  { %821 = vmatprep.subr.bf16.mxu1 %v2280_v33  ;;  %v2386_v33 = vld [vmem:[#allocation8 + $0x360] ss:$16 sps:$4 sm:$0xff]   ;;  %v2388_v34 = vld [vmem:[#allocation8 + $0x364] ss:$16 sps:$4 sm:$0xff]  }
  0x8f   :  { %847 = vmatpush1.bf16.msra.mxu0 %v2281_v36  ;;  %v2392_v36 = vld [vmem:[#allocation8 + $0x340] ss:$16 sps:$4 sm:$0xff]  }
  0x90   :  { %822 = vmatpush2.bf16.msra.mxu1 %v2278_v35  ;;  %848 = vmatprep.subr.bf16.mxu0 %v2289_v39  ;;  %v2367_v35 = vld [vmem:[#allocation8 + $0xec] ss:$16 sps:$4 sm:$0xff]   ;;  %v2400_v39 = vld [vmem:[#allocation8 + $0x324] ss:$16 sps:$4 sm:$0xff]  }
  0x91   :  { %823 = vmatprep.subr.bf16.mxu1 %v2286_v37  ;;  %v2394_v37 = vld [vmem:[#allocation8 + $0x344] ss:$16 sps:$4 sm:$0xff]  }
  0x93   :  { %849 = vmatpush1.bf16.msra.mxu0 %v2287_v41  ;;  %v2406_v41 = vld [vmem:[#allocation8 + $0x304] ss:$16 sps:$4 sm:$0xff]  }
  0x94   :  { %824 = vmatpush2.bf16.msra.mxu1 %v2284_v40  ;;  %1673 = vmatprep.subr.bf16.mxu0 %v2292_v42  ;;  %v2398_v40 = vld [vmem:[#allocation8 + $0x320] ss:$16 sps:$4 sm:$0xff]  }
  0x95   :  { %1714 = vmatprep.subr.bf16.mxu1 %v2319_v50  ;;  %v2404_v42 = vld [vmem:[#allocation8 + $0x300] ss:$16 sps:$4 sm:$0xff]  }
  0x96   :  { %867 = vmatmul.mubr.bf16.vlgmr.msra.gmra.mxu0 %v2634_v38  ;;  %v2331_v38 = vld [vmem:[#allocation8 + $0x2a4] ss:$16 sps:$4 sm:$0xff]  }
  0x97   :  { %826 = vmatmul.mubr.bf16.vlgmr.msra.gmra.mxu1 %v2637_v11  ;;  %1674 = vmatpush1.bf16.msra.mxu0 %v2290_v43  ;;  %v2328_v11 = vld [vmem:[#allocation8 + $0x1a4] ss:$16 sps:$4 sm:$0xff]   ;;  %v2415_v43 = vld [vmem:[#allocation8 + $0x2ec] ss:$16 sps:$4 sm:$0xff]  }
  0x98   :  { %1675 = vmatprep.subr.bf16.mxu0 %v2295_v44  ;;  %1715 = vmatpush1.bf16.msra.mxu1 %v2317_v49 }
  0x99   :  { %1716 = vmatprep.subr.bf16.mxu1 %v2325_v51  ;;  %v198_v51 = vld [vmem:[%s2692_s2] sm:$0xf] }
  0x9b   :  { %1676 = vmatpush1.bf16.msra.mxu0 %v2293_v45 }
  0x9c   :  { %1677 = vmatprep.subr.bf16.mxu0 %v2298_v46  ;;  %1717 = vmatpush1.bf16.msra.mxu1 %v2323_v54 }
  0x9d   :  { %1718 = vmatprep.subr.bf16.mxu1 %v2331_v38 }
  0x9f   :  { %1678 = vmatpush1.bf16.msra.mxu0 %v2296_v47 }
  0xa0   :  { %1679 = vmatprep.subr.bf16.mxu0 %v2301_v48  ;;  %1719 = vmatpush1.bf16.msra.mxu1 %v2329_v57  ;;  %v200_v48 = vlaneseq }
  0xa1   :  { %1720 = vmatprep.subr.bf16.mxu1 %v2337_v58 }
  0xa2   :  { %v2643_v49 = vshrl.u32 %v200_v48, 7  ;;  %v2425_v48 = vld [vmem:[#allocation8 + $0x2a8] ss:$16 sps:$4 sm:$0xff]  }
  0xa3   :  { %1680 = vmatpush1.bf16.msra.mxu0 %v2299_v52 }
  0xa4   :  { %1681 = vmatprep.subr.bf16.mxu0 %v2304_v53  ;;  %1721 = vmatpush1.bf16.msra.mxu1 %v2335_v61  ;;  %v2646_v50 = vsub.s32 0, %v2643_v49  ;;  %v206_v52 = vsub.s32 1, %v2643_v49 }
  0xa5   :  { %1722 = vmatprep.subr.bf16.mxu1 %v2343_v62 }
  0xa6   :  { %v203_v53 = vrot.slane %v198_v51, %v2646_v50  ;;  %v207_v54 = vrot.slane %v198_v51, %v206_v52 }
  0xa7   :  { %1682 = vmatpush1.bf16.msra.mxu0 %v2302_v55 }
  0xa8   :  { %1683 = vmatprep.subr.bf16.mxu0 %v2307_v56  ;;  %1723 = vmatpush1.bf16.msra.mxu1 %v2341_v2  ;;  %v2365_v2 = vld [vmem:[#allocation8 + $0xe8] ss:$16 sps:$4 sm:$0xff]  }
  0xa9   :  { %1724 = vmatprep.subr.bf16.mxu1 %v2349_v3 }
  0xab   :  { %1684 = vmatpush1.bf16.msra.mxu0 %v2305_v59 }
  0xac   :  { %1685 = vmatprep.subr.bf16.mxu0 %v2310_v60  ;;  %1725 = vmatpush1.bf16.msra.mxu1 %v2347_v6  ;;  %v2379_v6 = vld [vmem:[#allocation8 + $0xac] ss:$16 sps:$4 sm:$0xff]  }
  0xad   :  { %1726 = vmatprep.subr.bf16.mxu1 %v2355_v10  ;;  %v2391_v10 = vld [vmem:[#allocation8 + $0x6c] ss:$16 sps:$4 sm:$0xff]  }
  0xaf   :  { %1686 = vmatpush1.bf16.msra.mxu0 %v2308_v63 }
  0xb0   :  { %1687 = vmatprep.subr.bf16.mxu0 %v2313_v0  ;;  %1727 = vmatpush1.bf16.msra.mxu1 %v2353_v12  ;;  %v2659_v12 = vsub.s32 2, %v2643_v49 }
  0xb1   :  { %1728 = vmatprep.subr.bf16.mxu1 %v2361_v14  ;;  %v214_v14 = vsub.s32 3, %v2643_v49 }
  0xb3   :  { %1688 = vmatpush1.bf16.msra.mxu0 %v2311_v4  ;;  %v2373_v4 = vld [vmem:[#allocation8 + $0xcc] ss:$16 sps:$4 sm:$0xff]  }
  0xb4   :  { %1689 = vmatprep.subr.bf16.mxu0 %v2316_v5  ;;  %1729 = vmatpush1.bf16.msra.mxu1 %v2359_v16  ;;  %v2371_v5 = vld [vmem:[#allocation8 + $0xc8] ss:$16 sps:$4 sm:$0xff]   ;;  %v211_v16 = vrot.slane %v198_v51, %v2659_v12 }
  0xb5   :  { %1730 = vmatprep.subr.bf16.mxu1 %v2364_v18  ;;  %v215_v18 = vrot.slane %v198_v51, %v214_v14  ;;  %v2430_v51 = vld [vmem:[#allocation8 + $0x18c] ss:$16 sps:$4 sm:$0xff]  }
  0xb7   :  { %1690 = vmatpush2.bf16.msra.mxu0 %v2314_v7  ;;  %v2377_v7 = vld [vmem:[#allocation8 + $0xa8] ss:$16 sps:$4 sm:$0xff]  }
  0xb8   :  { %1691 = vmatprep.subr.bf16.mxu0 %v2322_v8  ;;  %1731 = vmatpush2.bf16.msra.mxu1 %v2362_v20  ;;  %v2385_v8 = vld [vmem:[#allocation8 + $0x8c] ss:$16 sps:$4 sm:$0xff]  }
  0xb9   :  { %1732 = vmatprep.subr.bf16.mxu1 %v2370_v23 }
  0xbb   :  { %1692 = vmatpush2.bf16.msra.mxu0 %v2320_v9  ;;  %v2383_v9 = vld [vmem:[#allocation8 + $0x88] ss:$16 sps:$4 sm:$0xff]  }
  0xbc   :  { %1693 = vmatprep.subr.bf16.mxu0 %v2328_v11  ;;  %1733 = vmatpush2.bf16.msra.mxu1 %v2368_v22  ;;  %v2389_v11 = vld [vmem:[#allocation8 + $0x68] ss:$16 sps:$4 sm:$0xff]  }
  0xbd   :  { %1734 = vmatprep.subr.bf16.mxu1 %v2376_v27  ;;  %v2401_v22 = vld [vmem:[#allocation8 + $0x28] ss:$16 sps:$4 sm:$0xff]  }
  0xbf   :  { %1694 = vmatpush2.bf16.msra.mxu0 %v2326_v13  ;;  %v2397_v13 = vld [vmem:[#allocation8 + $0x4c] ss:$16 sps:$4 sm:$0xff]  }
  0xc0   :  { %1695 = vmatprep.subr.bf16.mxu0 %v2334_v15  ;;  %1735 = vmatpush2.bf16.msra.mxu1 %v2374_v26  ;;  %v2395_v15 = vld [vmem:[#allocation8 + $0x48] ss:$16 sps:$4 sm:$0xff]  }
  0xc1   :  { %1736 = vmatprep.subr.bf16.mxu1 %v2382_v1  ;;  %v2407_v1 = vld [vmem:[#allocation8 + $0x8] ss:$16 sps:$4 sm:$0xff]  }
  0xc3   :  { %1696 = vmatpush2.bf16.msra.mxu0 %v2332_v17  ;;  %v2403_v17 = vld [vmem:[#allocation8 + $0x2c] ss:$16 sps:$4 sm:$0xff]  }
  0xc4   :  { %1697 = vmatprep.subr.bf16.mxu0 %v2340_v19  ;;  %1737 = vmatpush2.bf16.msra.mxu1 %v2380_v30 }
  0xc5   :  { %1738 = vmatprep.subr.bf16.mxu1 %v2388_v34  ;;  %v2412_v34 = vld [vmem:[#allocation8 + $0x1ec] ss:$16 sps:$4 sm:$0xff]  }
  0xc7   :  { %1698 = vmatpush2.bf16.msra.mxu0 %v2338_v21 }
  0xc8   :  { %1699 = vmatprep.subr.bf16.mxu0 %v2346_v24  ;;  %1739 = vmatpush2.bf16.msra.mxu1 %v2386_v33 }
  0xc9   :  { %1740 = vmatprep.subr.bf16.mxu1 %v2394_v37  ;;  %v2410_v37 = vld [vmem:[#allocation8 + $0x1e8] ss:$16 sps:$4 sm:$0xff]  }
  0xcb   :  { %1700 = vmatpush2.bf16.msra.mxu0 %v2344_v25  ;;  %v2409_v25 = vld [vmem:[#allocation8 + $0xc] ss:$16 sps:$4 sm:$0xff]  }
  0xcc   :  { %1701 = vmatprep.subr.bf16.mxu0 %v2352_v28  ;;  %1741 = vmatpush2.bf16.msra.mxu1 %v2392_v36 }
  0xcd   :  { %1742 = vmatprep.subr.bf16.mxu1 %v2400_v39  ;;  %v2413_v39 = vld [vmem:[#allocation8 + $0x2e8] ss:$16 sps:$4 sm:$0xff]  }
  0xcf   :  { %1702 = vmatpush2.bf16.msra.mxu0 %v2350_v29 }
  0xd0   :  { %1703 = vmatprep.subr.bf16.mxu0 %v2358_v31  ;;  %1743 = vmatpush2.bf16.msra.mxu1 %v2398_v40 }
  0xd1   :  { %1744 = vmatprep.subr.bf16.mxu1 %v2406_v41  ;;  %v2418_v41 = vld [vmem:[#allocation8 + $0x1cc] ss:$16 sps:$4 sm:$0xff]  }
  0xd3   :  { %1704 = vmatpush2.bf16.msra.mxu0 %v2356_v32 }
  0xd4   :  { %1755 = vmatprep.subr.bf16.mxu0 %v2367_v35  ;;  %1745 = vmatpush2.bf16.msra.mxu1 %v2404_v42  ;;  %v2421_v42 = vld [vmem:[#allocation8 + $0x2cc] ss:$16 sps:$4 sm:$0xff]  }
  0xd5   :  { %1796 = vmatprep.subr.bf16.mxu1 %v2415_v43  ;;  %v2416_v43 = vld [vmem:[#allocation8 + $0x1c8] ss:$16 sps:$4 sm:$0xff]  }
 0x117   :  { %v786_v44 = vpop.f32.mrf.mxu1 }
 0x119   :  { %v788_v45 = vpop.f32.mrf.mxu1 }
 0x11b   :  { %v790_v46 = vpop.f32.mrf.mxu1 }
 0x11c   :  { %v2427_v46 = vld [vmem:[#allocation8 + $0x2ac] ss:$16 sps:$4 sm:$0xff]  }
 0x11d   :  { %v791_v47 = vpop.f32.mrf.mxu1 }
 0x11e   :  { %v2422_v47 = vld [vmem:[#allocation8 + $0x1a8] ss:$16 sps:$4 sm:$0xff]  }
 0x136   :  { %v745_v38 = vpop.f32.mrf.mxu0 }
 0x137   :  { %v746_v55 = vadd.f32 %v745_v38, %v203_v53  ;;  %v2433_v53 = vld [vmem:[#allocation8 + $0x28c] ss:$16 sps:$4 sm:$0xff]   ;;  %v2431_v38 = vld [vmem:[#allocation8 + $0x288] ss:$16 sps:$4 sm:$0xff]  }
 0x138   :  { %v747_v56 = vpop.f32.mrf.mxu0 }
 0x139   :  { %v787_v57 = vadd.f32 %v786_v44, %v746_v55  ;;  %v748_v58 = vadd.f32 %v747_v56, %v207_v54  ;;  %v2419_v44 = vld [vmem:[#allocation8 + $0x2c8] ss:$16 sps:$4 sm:$0xff]   ;;  %v2436_v55 = vld [vmem:[#allocation8 + $0x16c] ss:$16 sps:$4 sm:$0xff]  }
 0x13a   :  { %v749_v59 = vpop.f32.mrf.mxu0  ;;  %v2428_v54 = vld [vmem:[#allocation8 + $0x188] ss:$16 sps:$4 sm:$0xff]   ;;  %v2439_v56 = vld [vmem:[#allocation8 + $0x26c] ss:$16 sps:$4 sm:$0xff]  }
 0x13b   :  { %v789_v60 = vadd.f32 %v788_v45, %v748_v58  ;;  %v875_v61 = vmax.f32 %v787_v57, 0.0  ;;  %v2424_v45 = vld [vmem:[#allocation8 + $0x1ac] ss:$16 sps:$4 sm:$0xff]   ;;  %v2434_v57 = vld [vmem:[#allocation8 + $0x168] ss:$16 sps:$4 sm:$0xff]  }
 0x13c   :  { %v750_v62 = vpop.f32.mrf.mxu0  ;;  %v2437_v58 = vld [vmem:[#allocation8 + $0x268] ss:$16 sps:$4 sm:$0xff]   ;;  %v2442_v59 = vld [vmem:[#allocation8 + $0x14c] ss:$16 sps:$4 sm:$0xff]  }
 0x13d   :  { %v876_v63 = vmax.f32 %v789_v60, 0.0  ;;  %v2655_v3 = vpack.c.bf16 %v875_v61, %v875_v61  ;;  %v2445_v60 = vld [vmem:[#allocation8 + $0x24c] ss:$16 sps:$4 sm:$0xff]   ;;  %v2440_v61 = vld [vmem:[#allocation8 + $0x148] ss:$16 sps:$4 sm:$0xff]  }
 0x13e   :  { %v2443_v62 = vld [vmem:[#allocation8 + $0x248] ss:$16 sps:$4 sm:$0xff]  }
 0x13f   :  { %v880_v0 = vpack.c.bf16 %v876_v63, %v876_v63  ;;  %v2448_v63 = vld [vmem:[#allocation8 + $0x12c] ss:$16 sps:$4 sm:$0xff]  }
 0x141   :  { %1705 = vmatprep.mubr.bf16.mxu0 %v880_v0 }
 0x142   :  { %1706 = vmatmul.mubr.bf16.vlgmr.msra.gmra.mxu0 %v2655_v3 }
 0x143   :  { %1756 = vmatpush1.bf16.msra.mxu0 %v2365_v2  ;;  %1787 = vmatprep.mubr.bf16.mxu0 %v880_v0  ;;  %v2451_v0 = vld [vmem:[#allocation8 + $0x22c] ss:$16 sps:$4 sm:$0xff]   ;;  %v2446_v2 = vld [vmem:[#allocation8 + $0x128] ss:$16 sps:$4 sm:$0xff]  }
 0x144   :  { %1757 = vmatprep.subr.bf16.mxu0 %v2373_v4  ;;  %v2449_v4 = vld [vmem:[#allocation8 + $0x228] ss:$16 sps:$4 sm:$0xff]  }
 0x147   :  { %1758 = vmatpush1.bf16.msra.mxu0 %v2371_v5  ;;  %v2454_v5 = vld [vmem:[#allocation8 + $0x10c] ss:$16 sps:$4 sm:$0xff]  }
 0x148   :  { %1759 = vmatprep.subr.bf16.mxu0 %v2379_v6  ;;  %v2457_v6 = vld [vmem:[#allocation8 + $0x20c] ss:$16 sps:$4 sm:$0xff]  }
 0x14b   :  { %1760 = vmatpush1.bf16.msra.mxu0 %v2377_v7  ;;  %v2452_v7 = vld [vmem:[#allocation8 + $0x108] ss:$16 sps:$4 sm:$0xff]  }
 0x14c   :  { %1761 = vmatprep.subr.bf16.mxu0 %v2385_v8  ;;  %v2455_v8 = vld [vmem:[#allocation8 + $0x208] ss:$16 sps:$4 sm:$0xff]  }
 0x14f   :  { %1762 = vmatpush1.bf16.msra.mxu0 %v2383_v9  ;;  %v2460_v9 = vld [vmem:[#allocation8 + $0x3ec] ss:$16 sps:$4 sm:$0xff]  }
 0x150   :  { %1763 = vmatprep.subr.bf16.mxu0 %v2391_v10  ;;  %v2458_v10 = vld [vmem:[#allocation8 + $0x3e8] ss:$16 sps:$4 sm:$0xff]  }
 0x153   :  { %1764 = vmatpush1.bf16.msra.mxu0 %v2389_v11  ;;  %v2463_v11 = vld [vmem:[#allocation8 + $0x3cc] ss:$16 sps:$4 sm:$0xff]  }
 0x154   :  { %1765 = vmatprep.subr.bf16.mxu0 %v2397_v13  ;;  %v2461_v13 = vld [vmem:[#allocation8 + $0x3c8] ss:$16 sps:$4 sm:$0xff]  }
 0x156   :  { %v868_v20 = vpop.f32.mrf.mxu0 }
 0x157   :  { %v827_v19 = vpop.f32.mrf.mxu1  ;;  %1766 = vmatpush1.bf16.msra.mxu0 %v2395_v15  ;;  %v2466_v15 = vld [vmem:[#allocation8 + $0x3ac] ss:$16 sps:$4 sm:$0xff]  }
 0x158   :  { %v828_v21 = vadd.f32 %v827_v19, %v211_v16  ;;  %v870_v24 = vpop.f32.mrf.mxu0  ;;  %1767 = vmatprep.subr.bf16.mxu0 %v2403_v17  ;;  %v2464_v16 = vld [vmem:[#allocation8 + $0x3a8] ss:$16 sps:$4 sm:$0xff]   ;;  %v2469_v17 = vld [vmem:[#allocation8 + $0x38c] ss:$16 sps:$4 sm:$0xff]  }
 0x159   :  { %v829_v23 = vpop.f32.mrf.mxu1  ;;  %v2472_v19 = vld [vmem:[#allocation8 + $0x36c] ss:$16 sps:$4 sm:$0xff]  }
 0x15a   :  { %v869_v26 = vadd.f32 %v868_v20, %v828_v21  ;;  %v830_v27 = vadd.f32 %v829_v23, %v215_v18  ;;  %v872_v29 = vpop.f32.mrf.mxu0  ;;  %v2467_v18 = vld [vmem:[#allocation8 + $0x388] ss:$16 sps:$4 sm:$0xff]   ;;  %v2475_v21 = vld [vmem:[#allocation8 + $0x34c] ss:$16 sps:$4 sm:$0xff]  }
 0x15b   :  { %v831_v28 = vpop.f32.mrf.mxu1  ;;  %1768 = vmatpush1.bf16.msra.mxu0 %v2401_v22  ;;  %v2470_v20 = vld [vmem:[#allocation8 + $0x368] ss:$16 sps:$4 sm:$0xff]  }
 0x15c   :  { %v871_v30 = vadd.f32 %v870_v24, %v830_v27  ;;  %v877_v31 = vmax.f32 %v869_v26, 0.0  ;;  %v873_v33 = vpop.f32.mrf.mxu0  ;;  %1769 = vmatprep.subr.bf16.mxu0 %v2409_v25  ;;  %v2473_v22 = vld [vmem:[#allocation8 + $0x348] ss:$16 sps:$4 sm:$0xff]   ;;  %v2481_v24 = vld [vmem:[#allocation8 + $0x30c] ss:$16 sps:$4 sm:$0xff]  }
 0x15d   :  { %v832_v32 = vpop.f32.mrf.mxu1  ;;  %v2476_v23 = vld [vmem:[#allocation8 + $0x328] ss:$16 sps:$4 sm:$0xff]  }
 0x15e   :  { %v878_v35 = vmax.f32 %v871_v30, 0.0  ;;  %v2665_v40 = vpack.c.bf16 %v877_v31, %v877_v31  ;;  %v2479_v25 = vld [vmem:[#allocation8 + $0x308] ss:$16 sps:$4 sm:$0xff]  }
 0x15f   :  { %1770 = vmatpush1.bf16.msra.mxu0 %v2407_v1  ;;  %v1011_v30 = vld [vmem:[%s2694_s4] sm:$0xf]  ;;  %v1841_v1 = vld [vmem:[#allocation9] sm:$0xf] }
 0x160   :  { %v882_v36 = vpack.c.bf16 %v878_v35, %v878_v35  ;;  %1771 = vmatprep.subr.bf16.mxu0 %v2412_v34  ;;  %v1016_v31 = vrot.slane %v1011_v30, %v2646_v50  ;;  %v1842_v32 = vunpack.c.l.bf16 %v1841_v1  ;;  %v1020_v33 = vrot.slane %v1011_v30, %v206_v52 }
 0x162   :  { %1746 = vmatprep.mubr.bf16.mxu1 %v882_v36  ;;  %v1847_v35 = vrot.slane %v1842_v32, %v2646_v50 }
 0x163   :  { %1747 = vmatmul.mubr.bf16.vlgmr.msra.gmra.mxu1 %v2665_v40  ;;  %1772 = vmatpush2.bf16.msra.mxu0 %v2410_v37 }
 0x164   :  { %1797 = vmatpush1.bf16.msra.mxu1 %v2413_v39  ;;  %1828 = vmatprep.mubr.bf16.mxu1 %v882_v36  ;;  %v1851_v36 = vrot.slane %v1842_v32, %v2659_v12 }
 0x165   :  { %1773 = vmatprep.subr.bf16.mxu0 %v2418_v41  ;;  %1798 = vmatprep.subr.bf16.mxu1 %v2421_v42 }
 0x167   :  { %1774 = vmatpush2.bf16.msra.mxu0 %v2416_v43  ;;  %v1867_v43 = vrot.slane %v1847_v35, %v2646_v50 }
 0x168   :  { %1799 = vmatpush1.bf16.msra.mxu1 %v2419_v44  ;;  %1775 = vmatprep.subr.bf16.mxu0 %v2424_v45  ;;  %v1871_v45 = vrot.slane %v1851_v36, %v2646_v50 }
 0x169   :  { %1800 = vmatprep.subr.bf16.mxu1 %v2427_v46 }
 0x16b   :  { %1776 = vmatpush2.bf16.msra.mxu0 %v2422_v47 }
 0x16c   :  { %1801 = vmatpush1.bf16.msra.mxu1 %v2425_v48  ;;  %1777 = vmatprep.subr.bf16.mxu0 %v2430_v51 }
 0x16d   :  { %1802 = vmatprep.subr.bf16.mxu1 %v2433_v53 }
 0x16f   :  { %1778 = vmatpush2.bf16.msra.mxu0 %v2428_v54 }
 0x170   :  { %1803 = vmatpush1.bf16.msra.mxu1 %v2431_v38  ;;  %1779 = vmatprep.subr.bf16.mxu0 %v2436_v55 }
 0x171   :  { %1804 = vmatprep.subr.bf16.mxu1 %v2439_v56 }
 0x173   :  { %1780 = vmatpush2.bf16.msra.mxu0 %v2434_v57  ;;  %v1854_v57 = vsub.s32 4, %v2643_v49 }
 0x174   :  { %1805 = vmatpush1.bf16.msra.mxu1 %v2437_v58  ;;  %1781 = vmatprep.subr.bf16.mxu0 %v2442_v59  ;;  %v1024_v58 = vrot.slane %v1011_v30, %v2659_v12  ;;  %v1858_v59 = vsub.s32 6, %v2643_v49 }
 0x175   :  { %1806 = vmatprep.subr.bf16.mxu1 %v2445_v60  ;;  %v1028_v60 = vrot.slane %v1011_v30, %v214_v14 }
 0x177   :  { %1782 = vmatpush2.bf16.msra.mxu0 %v2440_v61  ;;  %v1855_v61 = vrot.slane %v1842_v32, %v1854_v57 }
 0x178   :  { %1807 = vmatpush1.bf16.msra.mxu1 %v2443_v62  ;;  %1783 = vmatprep.subr.bf16.mxu0 %v2448_v63  ;;  %v1859_v63 = vrot.slane %v1842_v32, %v1858_v59 }
 0x179   :  { %1808 = vmatprep.subr.bf16.mxu1 %v2451_v0 }
 0x17b   :  { %1784 = vmatpush2.bf16.msra.mxu0 %v2446_v2 }
 0x17c   :  { %1809 = vmatpush1.bf16.msra.mxu1 %v2449_v4  ;;  %1785 = vmatprep.subr.bf16.mxu0 %v2454_v5  ;;  %v1875_v5 = vrot.slane %v1855_v61, %v2646_v50 }
 0x17d   :  { %1810 = vmatprep.subr.bf16.mxu1 %v2457_v6 }
 0x17f   :  { %1786 = vmatpush2.bf16.msra.mxu0 %v2452_v7 }
 0x180   :  { %1811 = vmatpush1.bf16.msra.mxu1 %v2455_v8 }
 0x181   :  { %1812 = vmatprep.subr.bf16.mxu1 %v2460_v9  ;;  %v1879_v9 = vrot.slane %v1859_v63, %v2646_v50 }
 0x182   :  { %1788 = vmatmul.mubr.bf16.vlgmr.msra.gmra.mxu0 %v2655_v3  ;;  %v2478_v3 = vld [vmem:[#allocation8 + $0x32c] ss:$16 sps:$4 sm:$0xff]  }
 0x184   :  { %1813 = vmatpush2.bf16.msra.mxu1 %v2458_v10 }
 0x185   :  { %1814 = vmatprep.subr.bf16.mxu1 %v2463_v11 }
 0x188   :  { %1815 = vmatpush2.bf16.msra.mxu1 %v2461_v13 }
 0x189   :  { %1816 = vmatprep.subr.bf16.mxu1 %v2466_v15 }
 0x18c   :  { %1817 = vmatpush2.bf16.msra.mxu1 %v2464_v16  ;;  %v2135_v16 = vld [vmem:[#allocation3] ss:$0 sm:$0xff] }
 0x18d   :  { %1818 = vmatprep.subr.bf16.mxu1 %v2469_v17 }
 0x190   :  { %1819 = vmatpush2.bf16.msra.mxu1 %v2467_v18 }
 0x191   :  { %1820 = vmatprep.subr.bf16.mxu1 %v2472_v19 }
 0x194   :  { %1821 = vmatpush2.bf16.msra.mxu1 %v2470_v20 }
 0x195   :  { %1822 = vmatprep.subr.bf16.mxu1 %v2475_v21 }
 0x198   :  { %1823 = vmatpush2.bf16.msra.mxu1 %v2473_v22 }
 0x199   :  { %1824 = vmatprep.subr.bf16.mxu1 %v2478_v3 }
 0x19c   :  { %1825 = vmatpush2.bf16.msra.mxu1 %v2476_v23 }
 0x19d   :  { %1826 = vmatprep.subr.bf16.mxu1 %v2481_v24 }
 0x1a0   :  { %1827 = vmatpush2.bf16.msra.mxu1 %v2479_v25 }
 0x1a3   :  { %1829 = vmatmul.mubr.bf16.vlgmr.msra.gmra.mxu1 %v2665_v40 }
 0x202   :  { %v1707_v26 = vpop.f32.mrf.mxu0 }
 0x203   :  { %v1708_v34 = vadd.f32 %v1707_v26, %v1016_v31 }
 0x204   :  { %v1709_v27 = vpop.f32.mrf.mxu0 }
 0x205   :  { %v1710_v39 = vadd.f32 %v1709_v27, %v1020_v33 }
 0x206   :  { %v1711_v28 = vpop.f32.mrf.mxu0 }
 0x208   :  { %v1712_v29 = vpop.f32.mrf.mxu0 }
 0x223   :  { %v1748_v37 = vpop.f32.mrf.mxu1 }
 0x224   :  { %v1749_v40 = vadd.f32 %v1748_v37, %v1708_v34 }
 0x225   :  { %v1750_v41 = vpop.f32.mrf.mxu1 }
 0x226   :  { %v1837_v42 = vmax.f32 %v1749_v40, 0.0  ;;  %v1751_v44 = vadd.f32 %v1750_v41, %v1710_v39 }
 0x227   :  { %v1752_v46 = vpop.f32.mrf.mxu1 }
 0x228   :  { %v1838_v47 = vmax.f32 %v1751_v44, 0.0  ;;  %v1880_v51 = vmul.f32 %v1867_v43, %v1837_v42 }
 0x229   :  { %v1753_v48 = vpop.f32.mrf.mxu1 }
 0x22a   :  { %v1881_v52 = vmul.f32 %v1871_v45, %v1838_v47 }
 0x22c   :  { %v1884_v53 = vadd.f32 %v1881_v52, %v1880_v51 }
 0x242   :  { %v1789_v54 = vpop.f32.mrf.mxu0 }
 0x243   :  { %v1790_v62 = vadd.f32 %v1789_v54, %v1024_v58 }
 0x244   :  { %v1791_v38 = vpop.f32.mrf.mxu0 }
 0x245   :  { %v1792_v2 = vadd.f32 %v1791_v38, %v1028_v60 }
 0x246   :  { %v1793_v55 = vpop.f32.mrf.mxu0 }
 0x248   :  { %v1794_v56 = vpop.f32.mrf.mxu0 }
 0x263   :  { %v1830_v0 = vpop.f32.mrf.mxu1 }
 0x264   :  { %v1831_v4 = vadd.f32 %v1830_v0, %v1790_v62 }
 0x265   :  { %v1832_v6 = vpop.f32.mrf.mxu1 }
 0x266   :  { %v1839_v7 = vmax.f32 %v1831_v4, 0.0  ;;  %v1833_v8 = vadd.f32 %v1832_v6, %v1792_v2 }
 0x267   :  { %v1834_v10 = vpop.f32.mrf.mxu1 }
 0x268   :  { %v1882_v12 = vmul.f32 %v1875_v5, %v1839_v7  ;;  %v1840_v11 = vmax.f32 %v1833_v8, 0.0 }
 0x269   :  { %v1835_v13 = vpop.f32.mrf.mxu1 }
 0x26a   :  { %v1883_v15 = vmul.f32 %v1879_v9, %v1840_v11  ;;  %v1885_v49 = vadd.f32 %v1884_v53, %v1882_v12 }
 0x26c   :  { %v1886_v14 = vadd.f32 %v1885_v49, %v1883_v15 }
 0x26e   :  { %1887 = vadd.xlane.f32.xlu0 %v1886_v14 }
 0x2f7   :  { %v1888_v17 = vpop.xlane.xlu0 %1887 }
 0x2f8   :  { %v1896_v18 = vadd.f32 %v2135_v16, %v1888_v17 }
 0x2fa   :  { %1898 = vst.msk [vmem:[%s2697_s7] sm:$0xff] %vm1897_vm1, %v1896_v18 }
 0x2fb   :  { %1903 = vsyncpa [#allocation5], 1 }
 0x2fc   :  { %1904 = vsyncpa [#allocation7], 1 }
 0x2fd   :  { %1905 = vsyncpa [#allocation10], 1 }

</bundles_post_ra>
